<compile_context>
chip_gen: v7x
topology: tpu7x:2x2x1
jax: 0.10.0
libtpu: 0.0.40
codegen_flags: <defaults>
</compile_context>

<pallas_src>
import functools

import numpy as np
import jax
import jax.numpy as jnp
from jax.experimental import pallas as pl
from jax.experimental.pallas import tpu as pltpu

LANE = 128
SUBLANE = 8
_MIN_TILE_F = 512                 # >=85% of HBM roofline per measured tile sweep
_MAX_TILE_F = 16384
_MAX_TILE_B = 1024
_DATA_TILE_TARGET = 8 << 20       # ~8 MiB per data-tile DMA


def _round_up(x, m):
    return (x + m - 1) // m * m


def _round_down(x, m):
    return x // m * m


@functools.lru_cache(maxsize=1)
def _vmem_budget_bytes():
    """Generation-aware budget for the resident (double-buffered) working set."""
    cap = 64 * 1024 * 1024                      # conservative: v7x per-TC VMEM
    try:
        info = pltpu.get_tpu_info()
        cap = int(getattr(info, "vmem_capacity_bytes", cap) or cap)
    except Exception:
        pass
    # ~3/4 of physical VMEM; the rest is headroom for compiler scratch.
    # v7x -> ~48 MiB, v5e/v6e -> ~96 MiB.
    return (cap // 4) * 3


# ---------------------------------------------------------------------------
# Tile planning
# ---------------------------------------------------------------------------
def _plan_fused(b, f, itemsize, budget):
    """Feature-tile width for the single-pass full-batch-block kernel.

    Returns None when a full-batch block cannot keep tile_f at the 512-lane
    floor (or at full width for narrow features) within the VMEM budget, in
    which case the caller uses the batch-tiled two-kernel path.
    """
    # Double-buffered: data in + data out (b rows each) + stats in/out rows.
    per_lane = 2 * (2 * b * itemsize) + 2 * (2 * 2 * 4)
    cap = _round_down(budget // per_lane, LANE)
    if cap < min(_MIN_TILE_F, _round_up(f, LANE)):
        return None
    tile_f = min(cap, _MAX_TILE_F)
    # ~8 MiB data-tile DMA target.
    tile_f = min(tile_f, max(_MIN_TILE_F,
                             _round_down(_DATA_TILE_TARGET // max(1, b * itemsize), LANE)))
    # Keep >= 4 feature-grid steps when F allows (v7x megacore + pipelining).
    if f >= 4 * _MIN_TILE_F:
        tile_f = min(tile_f, max(_MIN_TILE_F, _round_up(pl.cdiv(f, 4), LANE)))
    if f <= tile_f:
        return f                                 # single full-width block
    return tile_f                                # multiple of 128, partial last block OK


def _plan_tiled(b, f, itemsize, budget, max_batch_tile=None):
    """(tile_b, tile_f) for the batch-tiled stats / normalize kernels."""
    tb = _MAX_TILE_B if max_batch_tile is None else int(max_batch_tile)
    tb = max(SUBLANE, _round_down(tb, SUBLANE))
    if b <= tb:
        tb = b                                   # single full-batch block
    per_lane = 2 * (2 * tb * itemsize) + 2 * (2 * 2 * 4)
    cap = max(LANE, _round_down(budget // per_lane, LANE))
    tile_f = min(cap, _MAX_TILE_F)
    tile_f = min(tile_f, max(_MIN_TILE_F,
                             _round_down(_DATA_TILE_TARGET // max(1, tb * itemsize), LANE)))
    tile_f = max(tile_f, LANE)
    if f >= 4 * _MIN_TILE_F:
        tile_f = min(tile_f, max(_MIN_TILE_F, _round_up(pl.cdiv(f, 4), LANE)))
    if f <= tile_f:
        tile_f = f
    return tb, tile_f


# ---------------------------------------------------------------------------
# Kernels
# ---------------------------------------------------------------------------
def _running_update(mean, var, count_f32, batch_mean, batch_var, batch_count_f32,
                    normalizer_type, momentum):
    """Running-stat update (matches RunningMeanStd / EMA.update)."""
    if normalizer_type == "RunningMeanStd":
        total = count_f32 + batch_count_f32
        inv_total = 1.0 / total
        delta = batch_mean - mean
        new_mean = mean + delta * (batch_count_f32 * inv_total)
        m2 = (var * count_f32 + batch_var * batch_count_f32
              + delta * delta * (count_f32 * batch_count_f32 * inv_total))
        new_var = m2 * inv_total
    elif normalizer_type == "ExponentialMovingAverage":
        new_mean = momentum * mean + (1.0 - momentum) * batch_mean
        new_var = momentum * var + (1.0 - momentum) * batch_var
    else:
        raise ValueError(f"Invalid normalizer type: {normalizer_type}")
    return new_mean, new_var


def _fused_update_normalize_kernel(count_ref, data_ref, stats_ref,
                                   out_ref, new_stats_ref, *,
                                   eps, normalize_function, normalizer_type,
                                   momentum):
    """Training forward, single pass: batch stats -> running update -> normalize."""
    data = data_ref[...]                           # (B, tile_f)
    if data.dtype != jnp.float32:
        data = data.astype(jnp.float32)
    b = data.shape[0]
    bf = jnp.float32(b)
    mean = stats_ref[0:1, :]                       # (1, tile_f) f32
    var = stats_ref[1:2, :]

    # Exact-f32 batch reduction over the sublane axis (kernel is HBM-bound,
    # the reduction unit is never the binding slot).
    batch_mean = jnp.sum(data, axis=0, keepdims=True) * (1.0 / bf)
    centered = data - batch_mean
    # Unbiased variance, matches torch .var(dim=0); b == 1 -> nan/inf like torch.
    batch_var = (jnp.sum(centered * centered, axis=0, keepdims=True)
                 * (1.0 / jnp.float32(b - 1)))

    new_mean, new_var = _running_update(mean, var, count_ref[0].astype(jnp.float32),
                                        batch_mean, batch_var, bf,
                                        normalizer_type, momentum)
    new_stats_ref[0:1, :] = new_mean
    new_stats_ref[1:2, :] = new_var

    if normalize_function == "affine":
        scale = pl.reciprocal(jnp.sqrt(new_var) + eps, approx=False)
        out = (centered + (batch_mean - new_mean)) * scale      # reuse `centered`
    elif normalize_function == "translate":
        out = centered + (batch_mean - new_mean)
    elif normalize_function == "scale":
        scale = pl.reciprocal(jnp.sqrt(new_var) + eps, approx=False)
        out = data * scale
    else:                                           # identity: wrapper short-circuits
        out = data
    out_ref[...] = out.astype(out_ref.dtype)


def _stats_update_kernel(count_ref, data_ref, stats_ref, new_stats_ref, acc_ref, *,
                         batch_total, batch_tile, normalizer_type, momentum):
    """Batch-tiled stats pass: Welford/Chan combine across batch blocks, then
    the running-stat update at the last batch step (large-B / identity path)."""
    ib = pl.program_id(1)
    last = pl.num_programs(1) - 1

    @pl.when(ib == 0)
    def _init():
        acc_ref[...] = jnp.zeros_like(acc_ref)

    data = data_ref[...]                            # (tb, tile_f)
    if data.dtype != jnp.float32:
        data = data.astype(jnp.float32)
    tb = data.shape[0]
    b_off = ib * batch_tile

    if batch_total % batch_tile == 0:
        n_b = jnp.float32(batch_tile)
        chunk_mean = jnp.sum(data, axis=0, keepdims=True) * (1.0 / n_b)
        centered = data - chunk_mean
        chunk_m2 = jnp.sum(centered * centered, axis=0, keepdims=True)
    else:
        # Partial last batch block: out-of-range sublanes read garbage -> mask.
        remaining = jnp.int32(batch_total) - b_off
        n_b = jnp.minimum(remaining, tb).astype(jnp.float32)
        row = jax.lax.broadcasted_iota(jnp.int32, data.shape, 0)
        valid = row < remaining
        data = jnp.where(valid, data, 0.0)
        chunk_mean = jnp.sum(data, axis=0, keepdims=True) * (1.0 / n_b)
        centered = jnp.where(valid, data - chunk_mean, 0.0)
        chunk_m2 = jnp.sum(centered * centered, axis=0, keepdims=True)

    # Chan/Welford parallel combine (numerically safe for |mean| >> std,
    # unlike raw sum / sum-of-squares accumulation).
    n_a = b_off.astype(jnp.float32)
    mean_a = acc_ref[0:1, :]
    m2_a = acc_ref[1:2, :]
    n_tot = n_a + n_b
    delta = chunk_mean - mean_a
    w_b = n_b / n_tot
    acc_ref[0:1, :] = mean_a + delta * w_b
    acc_ref[1:2, :] = m2_a + chunk_m2 + delta * delta * (n_a * w_b)

    @pl.when(ib == last)
    def _finalize():
        bf = jnp.float32(batch_total)
        batch_mean = acc_ref[0:1, :]
        batch_var = acc_ref[1:2, :] * (1.0 / jnp.float32(batch_total - 1))
        new_mean, new_var = _running_update(
            stats_ref[0:1, :], stats_ref[1:2, :],
            count_ref[0].astype(jnp.float32),
            batch_mean, batch_var, bf, normalizer_type, momentum)
        new_stats_ref[0:1, :] = new_mean
        new_stats_ref[1:2, :] = new_var


def _normalize_kernel(data_ref, stats_ref, out_ref, *, eps, normalize_function):
    """Pure normalization with given (running) stats."""
    data = data_ref[...]
    mean = stats_ref[0:1, :]
    var = stats_ref[1:2, :]
    if normalize_function == "affine":
        scale = pl.reciprocal(jnp.sqrt(var) + eps, approx=False)
        out = (data - mean) * scale
    elif normalize_function == "scale":
        scale = pl.reciprocal(jnp.sqrt(var) + eps, approx=False)
        out = data * scale
    elif normalize_function == "translate":
        out = data - mean
    elif normalize_function == "identity":
        out = data
    else:
        raise ValueError(f"Invalid normalization function: {normalize_function}")
    out_ref[...] = out.astype(out_ref.dtype)


# ---------------------------------------------------------------------------
# pallas_call wrappers (data: (B, F), stats: (2, F) f32 — no padding, no slicing)
# ---------------------------------------------------------------------------
def _fused_update_normalize(data, stats, count, *, eps, normalize_function,
                            normalizer_type, momentum, tile_f):
    b, f = data.shape
    nf = pl.cdiv(f, tile_f)
    kernel = functools.partial(
        _fused_update_normalize_kernel, eps=eps,
        normalize_function=normalize_function,
        normalizer_type=normalizer_type, momentum=momentum)
    data_spec = pl.BlockSpec((b, tile_f), lambda j, c: (0, j))
    stats_spec = pl.BlockSpec((2, tile_f), lambda j, c: (0, j))
    return pl.pallas_call(
        kernel,
        out_shape=(jax.ShapeDtypeStruct((b, f), data.dtype),
                   jax.ShapeDtypeStruct((2, f), jnp.float32)),
        grid_spec=pltpu.PrefetchScalarGridSpec(
            num_scalar_prefetch=1,                 # `count` lands in SMEM
            grid=(nf,),
            in_specs=[data_spec, stats_spec],
            out_specs=(data_spec, stats_spec),
        ),
        compiler_params=pltpu.CompilerParams(
            dimension_semantics=("parallel",),
            vmem_limit_bytes=_vmem_budget_bytes(),
        ),
    )(count, data, stats)


def _stats_update(data, stats, count, *, normalizer_type, momentum,
                  tile_b, tile_f):
    b, f = data.shape
    nf = pl.cdiv(f, tile_f)
    nb = pl.cdiv(b, tile_b)
    kernel = functools.partial(
        _stats_update_kernel, batch_total=b, batch_tile=tile_b,
        normalizer_type=normalizer_type, momentum=momentum)
    return pl.pallas_call(
        kernel,
        out_shape=jax.ShapeDtypeStruct((2, f), jnp.float32),
        grid_spec=pltpu.PrefetchScalarGridSpec(
            num_scalar_prefetch=1,
            grid=(nf, nb),                         # batch (reduction) axis last
            in_specs=[pl.BlockSpec((tile_b, tile_f), lambda j, i, c: (i, j)),
                      pl.BlockSpec((2, tile_f), lambda j, i, c: (0, j))],
            out_specs=pl.BlockSpec((2, tile_f), lambda j, i, c: (0, j)),
            scratch_shapes=[pltpu.VMEM((2, tile_f), jnp.float32)],
        ),
        compiler_params=pltpu.CompilerParams(
            dimension_semantics=("parallel", "arbitrary"),
            vmem_limit_bytes=_vmem_budget_bytes(),
        ),
    )(count, data, stats)


def _normalize(data, stats, *, eps, normalize_function, tile_b, tile_f):
    b, f = data.shape
    nf = pl.cdiv(f, tile_f)
    nb = pl.cdiv(b, tile_b)
    kernel = functools.partial(_normalize_kernel, eps=eps,
                               normalize_function=normalize_function)
    return pl.pallas_call(
        kernel,
        out_shape=jax.ShapeDtypeStruct((b, f), data.dtype),
        grid_spec=pltpu.PrefetchScalarGridSpec(
            num_scalar_prefetch=0,
            grid=(nf, nb),
            in_specs=[pl.BlockSpec((tile_b, tile_f), lambda j, i: (i, j)),
                      pl.BlockSpec((2, tile_f), lambda j, i: (0, j))],
            out_specs=pl.BlockSpec((tile_b, tile_f), lambda j, i: (i, j)),
        ),
        compiler_params=pltpu.CompilerParams(
            dimension_semantics=("parallel", "parallel"),
            vmem_limit_bytes=_vmem_budget_bytes(),
        ),
    )(data, stats)


# ---------------------------------------------------------------------------
# Python-side module analogue (state holder; compute happens in Pallas)
# ---------------------------------------------------------------------------
class PallasNormalizer:
    """JAX/Pallas port of Normalizer.{forward, normalize, update}.

    normalizer_type: "RunningMeanStd" | "ExponentialMovingAverage" | None (Identity)
    max_fused_batch / max_batch_tile / max_tile_f: tuning knobs / test hooks to
    force the batch-tiled two-kernel path or small feature tiles at tiny shapes
    (max_tile_f must be a multiple of 128).
    """

    def __init__(self, normalizer_type, normalize_function, shape, momentum=0.9,
                 max_fused_batch=None, max_batch_tile=None, max_tile_f=None):
        if normalize_function not in {"affine", "scale", "translate", "identity"}:
            raise ValueError(f"Invalid normalize_function: {normalize_function}")
        if normalizer_type not in {None, "RunningMeanStd", "ExponentialMovingAverage"}:
            raise ValueError(f"Invalid normalizer_type: {normalizer_type}")
        self.normalizer_type = normalizer_type
        self.normalize_function = normalize_function
        self.momentum = float(momentum)
        self.shape = tuple(shape)
        self._f = int(np.prod(self.shape)) if len(self.shape) else 1
        # mean (row 0) and var (row 1) packed into one (2, F) f32 slab -> a
        # single stats DMA per feature tile instead of two.
        self._stats = jnp.concatenate(
            [jnp.zeros((1, self._f), jnp.float32),
             jnp.ones((1, self._f), jnp.float32)], axis=0)
        # TODO(synk): torch keeps an int64 count; int32 here (weights computed in
        # f32 inside the kernel) drifts slightly past ~16.7M accumulated samples.
        self.count = jnp.zeros((1,), dtype=jnp.int32)
        self._max_fused_batch = max_fused_batch
        self._max_batch_tile = max_batch_tile
        self._max_tile_f = max_tile_f

    # --- buffer views ------------------------------------------------------
    @property
    def mean(self):
        return self._stats[0].reshape(self.shape)

    @property
    def var(self):
        return self._stats[1].reshape(self.shape)

    @property
    def std(self):
        return jnp.sqrt(self.var)

    def set_mean_var(self, mean, var):
        m = (jnp.asarray(mean, jnp.float32).reshape(1, self._f)
             if mean is not None else self._stats[0:1])
        v = (jnp.asarray(var, jnp.float32).reshape(1, self._f)
             if var is not None else self._stats[1:2])
        self._stats = jnp.concatenate([m, v], axis=0)

    # --- helpers -----------------------------------------------------------
    def _cap_tile_f(self, tile_f):
        if self._max_tile_f is not None:
            tile_f = min(tile_f, int(self._max_tile_f))
        return tile_f

    # --- forward -----------------------------------------------------------
    def forward(self, data, epsilon=1e-8, training=True):
        b = data.shape[0]
        data2d = data.reshape(b, -1)               # free (row-major flatten)
        if data2d.shape[1] != self._f:
            raise ValueError(
                f"data features {data2d.shape[1]} != normalizer features {self._f}")
        f = self._f
        itemsize = data2d.dtype.itemsize
        budget = _vmem_budget_bytes()

        needs_update = training and self.normalizer_type is not None
        identity = self.normalize_function == "identity"

        tile_f_fused = None
        if needs_update and not identity:
            tile_f_fused = _plan_fused(b, f, itemsize, budget)
            if (self._max_fused_batch is not None and b > self._max_fused_batch):
                tile_f_fused = None                # force the batch-tiled path

        if tile_f_fused is not None:
            out2d, new_stats = _fused_update_normalize(
                data2d, self._stats, self.count,
                eps=float(epsilon),
                normalize_function=self.normalize_function,
                normalizer_type=self.normalizer_type,
                momentum=self.momentum,
                tile_f=self._cap_tile_f(tile_f_fused))
            self._stats = new_stats
        else:
            if needs_update:
                tb, tf = _plan_tiled(b, f, itemsize, budget, self._max_batch_tile)
                self._stats = _stats_update(
                    data2d, self._stats, self.count,
                    normalizer_type=self.normalizer_type,
                    momentum=self.momentum,
                    tile_b=tb, tile_f=self._cap_tile_f(tf))
            if identity:
                out2d = data2d                     # free: skip the copy kernel
            else:
                tb, tf = _plan_tiled(b, f, itemsize, budget, self._max_batch_tile)
                out2d = _normalize(
                    data2d, self._stats,
                    eps=float(epsilon),
                    normalize_function=self.normalize_function,
                    tile_b=tb, tile_f=self._cap_tile_f(tf))

        if training:                               # all torch variants bump count
            self.count = self.count + jnp.int32(b)
        return out2d.reshape(data.shape)


# ---------------------------------------------------------------------------
# Pure reference (mirrors the PyTorch module) for correctness checks
# ---------------------------------------------------------------------------
def _ref_update(ref, data, normalizer_type, momentum):
    bm = data.mean(axis=0)
    bv = data.var(axis=0, ddof=1)
    bc = data.shape[0]
    if normalizer_type == "RunningMeanStd":
        delta = bm - ref["mean"]
        total = ref["count"] + bc
        new_mean = ref["mean"] + delta * bc / total
        m2 = (ref["var"] * ref["count"] + bv * bc
              + delta * delta * (ref["count"] * bc / total))
        ref["mean"], ref["var"], ref["count"] = new_mean, m2 / total, total
    elif normalizer_type == "ExponentialMovingAverage":
        ref["mean"] = momentum * ref["mean"] + (1.0 - momentum) * bm
        ref["var"] = momentum * ref["var"] + (1.0 - momentum) * bv
        ref["count"] += bc
    else:
        raise ValueError(normalizer_type)


def _ref_normalize(ref, data, fn, eps=1e-8):
    if fn == "affine":
        return (data - ref["mean"]) / (np.sqrt(ref["var"]) + eps)
    if fn == "scale":
        return data / (np.sqrt(ref["var"]) + eps)
    if fn == "translate":
        return data - ref["mean"]
    return data


def _run_case(name, normalizer_type, fn, batch, feat_shape, steps=2, **hooks):
    f = int(np.prod(feat_shape))
    norm = PallasNormalizer(normalizer_type, fn, feat_shape, momentum=0.9, **hooks)
    ref = {"mean": np.zeros((f,), np.float64),
           "var": np.ones((f,), np.float64),
           "count": 0.0}
    key = jax.random.PRNGKey(0)
    for s in range(steps):
        key, sub = jax.random.split(key)
        x = (jax.random.normal(sub, (batch,) + tuple(feat_shape), dtype=jnp.float32)
             * (1.5 + 0.5 * s) + (0.3 - 0.7 * s))
        out = norm.forward(x, training=True)
        jax.block_until_ready(out)

        xn = np.asarray(x, np.float64).reshape(batch, f)
        if normalizer_type is not None:
            _ref_update(ref, xn, normalizer_type, 0.9)
        else:
            ref["count"] += batch
        out_ref = _ref_normalize(ref, xn, fn)

        np.testing.assert_allclose(np.asarray(out).reshape(batch, f), out_ref,
                                   rtol=1e-5, atol=1e-5, err_msg=name)
        np.testing.assert_allclose(np.asarray(norm.mean).reshape(f), ref["mean"],
                                   rtol=1e-5, atol=1e-5, err_msg=name)
        np.testing.assert_allclose(np.asarray(norm.var).reshape(f), ref["var"],
                                   rtol=1e-5, atol=1e-5, err_msg=name)
        assert int(norm.count[0]) == int(ref["count"]), name
    return norm, ref


# ---------------------------------------------------------------------------
if __name__ == "__main__":
    # 1) RunningMeanStd + affine: fused single-pass path (common case).
    norm_rms, ref_rms = _run_case("rms_affine_fused", "RunningMeanStd", "affine",
                                  batch=8, feat_shape=(32,), steps=2)

    # 1b) Eval-mode forward on the trained normalizer (normalize-only kernel).
    x_eval = jax.random.normal(jax.random.PRNGKey(0), (8, 32), dtype=jnp.float32)
    out_eval = norm_rms.forward(x_eval, training=False)
    jax.block_until_ready(out_eval)
    np.testing.assert_allclose(
        np.asarray(out_eval),
        _ref_normalize(ref_rms, np.asarray(x_eval, np.float64), "affine"),
        rtol=1e-5, atol=1e-5, err_msg="rms_affine_eval")
    assert int(norm_rms.count[0]) == int(ref_rms["count"])

    # 2) EMA + scale on a multi-dim feature shape (fused path).
    _run_case("ema_scale_fused", "ExponentialMovingAverage", "scale",
              batch=8, feat_shape=(4, 16), steps=2)

    # 3) Identity normalizer (type None) + translate (normalize-only kernel).
    _run_case("identity_normalizer", None, "translate",
              batch=8, feat_shape=(32,), steps=1)

    # 4) Large-batch fallback forced small: two-kernel batch-tiled path with a
    #    partial (masked) last batch block and a partial last feature block.
    _run_case("rms_affine_batch_tiled", "RunningMeanStd", "affine",
              batch=12, feat_shape=(300,), steps=2,
              max_fused_batch=0, max_batch_tile=8, max_tile_f=128)

    # 5) Partial last feature block on the fused path (F not a multiple of 128).
    _run_case("rms_translate_partial_lanes", "RunningMeanStd", "translate",
              batch=8, feat_shape=(300,), steps=1, max_tile_f=128)

    # 6) identity normalize_function with a stats update: stats-only kernel,
    #    output is a free passthrough (no copy kernel launched).
    _run_case("ema_identity_fn", "ExponentialMovingAverage", "identity",
              batch=8, feat_shape=(32,), steps=1)

    print("KERNEL_OK")
</pallas_src>

<mosaic_0001>
module attributes {stable_mosaic.version = 11 : i64} {
  func.func @_fused_update_normalize_kernel(%arg0: i32, %arg1: memref<1xi32, #tpu.memory_space<smem>>, %arg2: memref<8x32xf32, #tpu.memory_space<vmem>>, %arg3: memref<2x32xf32, #tpu.memory_space<vmem>>, %arg4: memref<8x32xf32, #tpu.memory_space<vmem>>, %arg5: memref<2x32xf32, #tpu.memory_space<vmem>>) attributes {dimension_semantics = [#tpu.dimension_semantics<parallel>], iteration_bounds = array<i64: 1>, scalar_prefetch = 1 : i64, scratch_operands = 0 : i64, tpu.core_type = #tpu.core_type<tc>, window_params = [{transform_indices = @transform_0, window_bounds = array<i64: 8, 32>}, {transform_indices = @transform_1, window_bounds = array<i64: 2, 32>}, {transform_indices = @transform_2, window_bounds = array<i64: 8, 32>}, {transform_indices = @transform_3, window_bounds = array<i64: 2, 32>}]} {
    %c0 = arith.constant 0 : index
    %c0_0 = arith.constant 0 : index
    %0 = vector.load %arg2[%c0, %c0_0] : memref<8x32xf32, #tpu.memory_space<vmem>>, vector<8x32xf32>
    %c0_1 = arith.constant 0 : index
    %c0_2 = arith.constant 0 : index
    %1 = vector.load %arg3[%c0_1, %c0_2] : memref<2x32xf32, #tpu.memory_space<vmem>>, vector<1x32xf32>
    %c1 = arith.constant 1 : index
    %c0_3 = arith.constant 0 : index
    %2 = vector.load %arg3[%c1, %c0_3] : memref<2x32xf32, #tpu.memory_space<vmem>>, vector<1x32xf32>
    %cst = arith.constant dense<0.000000e+00> : vector<32xf32>
    %3 = vector.multi_reduction <add>, %0, %cst [0] : vector<8x32xf32> to vector<32xf32>
    %4 = vector.shape_cast %3 : vector<32xf32> to vector<1x32xf32>
    %cst_4 = arith.constant 1.000000e+00 : f32
    %cst_5 = arith.constant 8.000000e+00 : f32
    %5 = arith.divf %cst_4, %cst_5 : f32
    %6 = vector.broadcast %5 : f32 to vector<1x32xf32>
    %7 = arith.mulf %4, %6 : vector<1x32xf32>
    %8 = vector.broadcast %7 : vector<1x32xf32> to vector<8x32xf32>
    %9 = arith.subf %0, %8 : vector<8x32xf32>
    %10 = arith.mulf %9, %9 : vector<8x32xf32>
    %cst_6 = arith.constant dense<0.000000e+00> : vector<32xf32>
    %11 = vector.multi_reduction <add>, %10, %cst_6 [0] : vector<8x32xf32> to vector<32xf32>
    %12 = vector.shape_cast %11 : vector<32xf32> to vector<1x32xf32>
    %cst_7 = arith.constant 1.000000e+00 : f32
    %cst_8 = arith.constant 7.000000e+00 : f32
    %13 = arith.divf %cst_7, %cst_8 : f32
    %14 = vector.broadcast %13 : f32 to vector<1x32xf32>
    %15 = arith.mulf %12, %14 : vector<1x32xf32>
    %c0_9 = arith.constant 0 : index
    %16 = memref.load %arg1[%c0_9] : memref<1xi32, #tpu.memory_space<smem>>
    %17 = arith.sitofp %16 : i32 to f32
    %cst_10 = arith.constant 8.000000e+00 : f32
    %18 = arith.addf %17, %cst_10 : f32
    %cst_11 = arith.constant 1.000000e+00 : f32
    %19 = arith.divf %cst_11, %18 : f32
    %20 = arith.subf %7, %1 : vector<1x32xf32>
    %cst_12 = arith.constant 8.000000e+00 : f32
    %21 = arith.mulf %cst_12, %19 : f32
    %22 = vector.broadcast %21 : f32 to vector<1x32xf32>
    %23 = arith.mulf %20, %22 : vector<1x32xf32>
    %24 = arith.addf %1, %23 : vector<1x32xf32>
    %25 = vector.broadcast %17 : f32 to vector<1x32xf32>
    %26 = arith.mulf %2, %25 : vector<1x32xf32>
    %cst_13 = arith.constant 8.000000e+00 : f32
    %27 = vector.broadcast %cst_13 : f32 to vector<1x32xf32>
    %28 = arith.mulf %15, %27 : vector<1x32xf32>
    %29 = arith.addf %26, %28 : vector<1x32xf32>
    %30 = arith.mulf %20, %20 : vector<1x32xf32>
    %cst_14 = arith.constant 8.000000e+00 : f32
    %31 = arith.mulf %17, %cst_14 : f32
    %32 = arith.mulf %31, %19 : f32
    %33 = vector.broadcast %32 : f32 to vector<1x32xf32>
    %34 = arith.mulf %30, %33 : vector<1x32xf32>
    %35 = arith.addf %29, %34 : vector<1x32xf32>
    %36 = vector.broadcast %19 : f32 to vector<1x32xf32>
    %37 = arith.mulf %35, %36 : vector<1x32xf32>
    %c0_15 = arith.constant 0 : index
    %c0_16 = arith.constant 0 : index
    %38 = vector.load %arg5[%c0_15, %c0_16] : memref<2x32xf32, #tpu.memory_space<vmem>>, vector<1x32xf32>
    tpu.vector_store %arg5[%c0_15, %c0_16], %24 {strides = array<i32>} : memref<2x32xf32, #tpu.memory_space<vmem>>, vector<1x32xf32>,
    %c1_17 = arith.constant 1 : index
    %c0_18 = arith.constant 0 : index
    %39 = vector.load %arg5[%c1_17, %c0_18] : memref<2x32xf32, #tpu.memory_space<vmem>>, vector<1x32xf32>
    tpu.vector_store %arg5[%c1_17, %c0_18], %37 {strides = array<i32>} : memref<2x32xf32, #tpu.memory_space<vmem>>, vector<1x32xf32>,
    %40 = math.sqrt %37 : vector<1x32xf32>
    %cst_19 = arith.constant 9.99999993E-9 : f32
    %41 = vector.broadcast %cst_19 : f32 to vector<1x32xf32>
    %42 = arith.addf %40, %41 : vector<1x32xf32>
    %43 = tpu.reciprocal %42 : vector<1x32xf32> -> vector<1x32xf32>
    %44 = arith.subf %7, %24 : vector<1x32xf32>
    %45 = vector.broadcast %44 : vector<1x32xf32> to vector<8x32xf32>
    %46 = arith.addf %9, %45 : vector<8x32xf32>
    %47 = vector.broadcast %43 : vector<1x32xf32> to vector<8x32xf32>
    %48 = arith.mulf %46, %47 : vector<8x32xf32>
    %c0_20 = arith.constant 0 : index
    %c0_21 = arith.constant 0 : index
    %49 = vector.load %arg4[%c0_20, %c0_21] : memref<8x32xf32, #tpu.memory_space<vmem>>, vector<8x32xf32>
    tpu.vector_store %arg4[%c0_20, %c0_21], %48 {strides = array<i32>} : memref<8x32xf32, #tpu.memory_space<vmem>>, vector<8x32xf32>,
    return
  }
  func.func @transform_0(%arg0: i32, %arg1: memref<1xi32, #tpu.memory_space<smem>>) -> (i32, i32) {
    %c0_i32 = arith.constant 0 : i32
    %c0_i32_0 = arith.constant 0 : i32
    return %c0_i32, %arg0 : i32, i32
  }
  func.func @transform_1(%arg0: i32, %arg1: memref<1xi32, #tpu.memory_space<smem>>) -> (i32, i32) {
    %c0_i32 = arith.constant 0 : i32
    %c0_i32_0 = arith.constant 0 : i32
    return %c0_i32, %arg0 : i32, i32
  }
  func.func @transform_2(%arg0: i32, %arg1: memref<1xi32, #tpu.memory_space<smem>>) -> (i32, i32) {
    %c0_i32 = arith.constant 0 : i32
    %c0_i32_0 = arith.constant 0 : i32
    return %c0_i32, %arg0 : i32, i32
  }
  func.func @transform_3(%arg0: i32, %arg1: memref<1xi32, #tpu.memory_space<smem>>) -> (i32, i32) {
    %c0_i32 = arith.constant 0 : i32
    %c0_i32_0 = arith.constant 0 : i32
    return %c0_i32, %arg0 : i32, i32
  }
}

</mosaic_0001>

<bundles_post_ra>
// kernel: tpu_custom_call.1
= control target key start
LH: loop header
LB: loop body
LE: loop exit
PB: predicated region body
PF: predicated region fallthrough
CT: control target
= control target key end

     0   :  { %11 = vsyncpa [#allocation5], 0  ;;  %s301_s0 = inlined_call_operand.<no memory space> [shape: s32[1], index: 0, kind: input, shape index: {}]   ;;  %s302_s1 = inlined_call_operand.hbm [shape: f32[8,32], index: 1, kind: input, shape index: {}]   ;;  %s303_s2 = inlined_call_operand.vmem [shape: f32[2,32], index: 2, kind: input, shape index: {}]   ;;  %s304_s3 = inlined_call_operand.hbm [shape: f32[8,32], index: 3, kind: output, shape index: {0}]   ;;  %s305_s4 = inlined_call_operand.hbm [shape: f32[2,32], index: 4, kind: output, shape index: {1}]  }
   0x1   :  { %12 = vsyncpa [#allocation6], 0 }
   0x2   :  { %13 = vsyncpa [#allocation9], 0  ;;  %s210_s15 = smov [#allocation4]   ;;  %s138_s19 = scalar_lea.hbm %s302_s1, 128 }
   0x3   :  { %s20_s16 = sshll.u32 %s210_s15, 4  ;;  %p139_p0 = scmp.ne.s32.totalorder %s302_s1, %s138_s19  ;;  %s21_s16 = int_to_ptr.vmem [resolvable:$true] %s20_s16 }
   0x4   :  { %p142_p1 = scmp.lt.u32.totalorder %s138_s19, %s302_s1 }
   0x6   :  { %p144_p2 = pnand %p142_p1, %p139_p0 }
   0x8   :  { %147 = shalt.err (!%p144_p2)
}
   0x9   :  { %s148_s24 = scalar_lea.vmem %s21_s16, 128  ;;  %p153_p4 = scmp.lt.s32.totalorder %s21_s16, %s21_s16 }
   0xa   :  { %p149_p3 = scmp.ne.s32.totalorder %s21_s16, %s148_s24  ;;  %p154_p5 = scmp.lt.s32.totalorder %s148_s24, %s148_s24 }
   0xc   :  { %p155_p6 = por %p154_p5, %p153_p4 }
   0xe   :  { %p156_p7 = pnand %p155_p6, %p149_p3 }
  0x10   :  { %159 = shalt.err (!%p156_p7)
}
  0x11   :  { %23 = dma.hbm_to_vmem [thread:$0]  %s302_s1, 128, %s21_s16, [#allocation5]  }
  0x12   :  { %s253_s29 = scvt.s32.f32 %s301_s0 }
  0x13   :  { %204 = dma.done.wait [#allocation5], 128  }
  0x14   :  { %205 = vsyncadd [#allocation5], 4294967168  ;;  %s53_s30 = sadd.f32 8.0, %s253_s29  ;;  %vm32_vm0 = vcmask 261120   ;;  %v29_v1 = vld [vmem:[#allocation4] sm:$0xff]  ;;  %v62_v23 = vstv %s253_s29  ;;  %s67_s7 = smul.f32 8.0, %s253_s29 }
  0x15   :  { %v33_v2 = vsel %vm32_vm0, %v29_v1, 0.0  ;;  %v30_v20 = vld [vmem:[%s303_s2] sm:$0x1]  ;;  %v31_v22 = vld [vmem:[%s303_s2 + $0x1] sm:$0x1]  ;;  %vm74_vm1 = vcmask 253952  }
  0x16   :  { %v54_v0 = vstv %s53_s30  ;;  %v34_v3 = vrot.slane %v33_v2, 4  ;;  %v63_v25 = vmul.f32 %v62_v23, %v31_v22  ;;  %s211_s11 = smov [#allocation8]  }
  0x17   :  { %132 = vrcp.f32 %v54_v0  ;;  %s114_s12 = sshll.u32 %s211_s11, 4  ;;  %s115_s12 = int_to_ptr.vmem [resolvable:$true] %s114_s12 }
  0x18   :  { %v35_v4 = vadd.f32 %v34_v3, %v33_v2  ;;  %s160_s2 = scalar_lea.vmem %s115_s12, 32  ;;  %p165_p9 = scmp.lt.s32.totalorder %s115_s12, %s115_s12 }
  0x19   :  { %p161_p8 = scmp.ne.s32.totalorder %s115_s12, %s160_s2  ;;  %p166_p10 = scmp.lt.s32.totalorder %s160_s2, %s160_s2 }
  0x1a   :  { %v36_v5 = vrot.slane %v35_v4, 2 }
  0x1b   :  { %p167_p11 = por %p166_p10, %p165_p9 }
  0x1c   :  { %v37_v7 = vadd.f32 %v36_v5, %v35_v4 }
  0x1d   :  { %p168_p12 = pnand %p167_p11, %p161_p8 }
  0x1e   :  { %v38_v8 = vrot.slane %v37_v7, 1 }
  0x20   :  { %v39_v9 = vadd.f32 %v38_v8, %v37_v7 }
  0x21   :  { %v133_v6 = vpop.eup %132 }
  0x22   :  { %127 = vpush %v133_v6  ;;  %v257_v10 = vmul.f32 0.125, %v39_v9 }
  0x24   :  { %v260_v11 = vsub.f32 %v29_v1, %v257_v10  ;;  %v57_v24 = vsub.f32 %v257_v10, %v30_v20 }
  0x26   :  { %v42_v12 = vmul.f32 %v260_v11, %v260_v11  ;;  %v66_v27 = vmul.f32 %v57_v24, %v57_v24 }
  0x28   :  { %v43_v13 = vsel %vm32_vm0, %v42_v12, 0.0 }
  0x29   :  { %v44_v14 = vrot.slane %v43_v13, 4 }
  0x2b   :  { %v45_v15 = vadd.f32 %v44_v14, %v43_v13 }
  0x2d   :  { %v46_v16 = vrot.slane %v45_v15, 2 }
  0x2f   :  { %v47_v17 = vadd.f32 %v46_v16, %v45_v15 }
  0x31   :  { %v48_v18 = vrot.slane %v47_v17, 1 }
  0x33   :  { %v49_v19 = vadd.f32 %v48_v18, %v47_v17 }
  0x35   :  { %v50_v21 = vmul.f32 0.14285715, %v49_v19 }
  0x37   :  { %v64_v26 = vmul.f32 8.0, %v50_v21 }
  0x39   :  { %v65_v29 = vadd.f32 %v64_v26, %v63_v25 }
  0x53   :  { %s128_s8 = spop %127 }
  0x54   :  { %s58_s9 = smul.f32 8.0, %s128_s8  ;;  %v72_v35 = vstv %s128_s8 }
  0x55   :  { %s68_s10 = smul.f32 %s128_s8, %s67_s7 }
  0x56   :  { %v59_v28 = vstv %s58_s9 }
  0x57   :  { %v60_v30 = vmul.f32 %v59_v28, %v57_v24  ;;  %v69_v31 = vstv %s68_s10 }
  0x58   :  { %v70_v32 = vmul.f32 %v69_v31, %v66_v27 }
  0x59   :  { %v61_v33 = vadd.f32 %v60_v30, %v30_v20 }
  0x5a   :  { %v71_v34 = vadd.f32 %v70_v32, %v65_v29 }
  0x5b   :  { %75 = vst.msk [vmem:[#allocation8] sm:$0x1] %vm74_vm1, %v61_v33 }
  0x5c   :  { %v73_v36 = vmul.f32 %v72_v35, %v71_v34 }
  0x5e   :  { %134 = vrsqrt.f32 %v73_v36  ;;  %76 = vst.msk [vmem:[#allocation8 + $0x1] sm:$0x1] %vm74_vm1, %v73_v36 }
  0x5f   :  { %171 = shalt.err (!%p168_p12)
}
  0x60   :  { %s172_s15 = scalar_lea.hbm %s305_s4, 32 }
  0x61   :  { %p173_p13 = scmp.ne.s32.totalorder %s305_s4, %s172_s15  ;;  %p176_p0 = scmp.lt.u32.totalorder %s172_s15, %s305_s4 }
  0x63   :  { %p178_p1 = pnand %p176_p0, %p173_p13 }
  0x65   :  { %181 = shalt.err (!%p178_p1)
}
  0x66   :  { %117 = dma.vmem_to_hbm [thread:$0]  %s115_s12, 32, %s305_s4, [#allocation9]   ;;  %v87_v39 = vlaneseq  ;;  %vm79_vm2 = vcmp.eq.f32.partialorder %v73_v36, inf  ;;  %v82_v40 = vand.u32 2147483648, %v73_v36  ;;  %vm81_vm3 = vcmp.eq.f32.partialorder %v73_v36, 0.0 }
  0x67   :  { %v86_v45 = vsub.f32 %v257_v10, %v61_v33  ;;  %s212_s22 = smov [#allocation7]  }
  0x68   :  { %v135_v37 = vpop.eup %134  ;;  %v88_v44 = vshrl.u32 %v87_v39, 7  ;;  %s104_s23 = sshll.u32 %s212_s22, 4  ;;  %s105_s23 = int_to_ptr.vmem [resolvable:$true] %s104_s23 }
  0x69   :  { %v78_v38 = vmul.f32 %v135_v37, %v73_v36  ;;  %s182_s4 = scalar_lea.vmem %s105_s23, 128  ;;  %p187_p3 = scmp.lt.s32.totalorder %s105_s23, %s105_s23 }
  0x6a   :  { %v89_v46 = vsub.s32 0, %v88_v44  ;;  %p183_p2 = scmp.ne.s32.totalorder %s105_s23, %s182_s4  ;;  %p188_p4 = scmp.lt.s32.totalorder %s182_s4, %s182_s4 }
  0x6b   :  { %v80_v41 = vsel %vm79_vm2, %v73_v36, %v78_v38 }
  0x6c   :  { %v83_v42 = vsel %vm81_vm3, %v82_v40, %v80_v41  ;;  %v90_v47 = vrot.slane %v86_v45, %v89_v46  ;;  %p189_p5 = por %p188_p4, %p187_p3 }
  0x6d   :  { %v84_v43 = vadd.f32 1e-08, %v83_v42 }
  0x6e   :  { %v91_v49 = vadd.f32 %v90_v47, %v260_v11  ;;  %p190_p6 = pnand %p189_p5, %p183_p2 }
  0x6f   :  { %136 = vrcp.f32 %v84_v43 }
  0x79   :  { %v137_v48 = vpop.eup %136 }
  0x7a   :  { %v95_v50 = vrot.slane %v137_v48, %v89_v46 }
  0x7c   :  { %v96_v51 = vmul.f32 %v95_v50, %v91_v49 }
  0x7e   :  { %97 = vst.msk [vmem:[#allocation7] sm:$0xff] %vm32_vm0, %v96_v51 }
  0x7f   :  { %193 = shalt.err (!%p190_p6)
}
  0x80   :  { %s194_s26 = scalar_lea.hbm %s304_s3, 128 }
  0x81   :  { %p195_p7 = scmp.ne.s32.totalorder %s304_s3, %s194_s26  ;;  %p198_p8 = scmp.lt.u32.totalorder %s194_s26, %s304_s3 }
  0x83   :  { %p200_p9 = pnand %p198_p8, %p195_p7 }
  0x85   :  { %203 = shalt.err (!%p200_p9)
}
  0x86   :  { %107 = dma.vmem_to_hbm [thread:$0]  %s105_s23, 128, %s304_s3, [#allocation6]  }
  0x87   :  { %206 = dma.done.wait [#allocation6], 128  }
  0x88   :  { %207 = vsyncadd [#allocation6], 4294967168 }
  0x89   :  { %208 = dma.done.wait [#allocation9], 32  }
  0x8a   :  { %209 = vsyncadd [#allocation9], 4294967264 }
  0x8b   :  { %124 = vsyncpa [#allocation5], 1 }
  0x8c   :  { %125 = vsyncpa [#allocation6], 1 }
  0x8d   :  { %126 = vsyncpa [#allocation9], 1 }

</bundles_post_ra>
